<compile_context>
chip_gen: v7x
topology: tpu7x:2x2x1
jax: 0.10.0
libtpu: 0.0.40
codegen_flags: <defaults>
</compile_context>

<pallas_src>
import math
import functools

import jax
import jax.numpy as jnp
from jax.experimental import pallas as pl
from jax.experimental.pallas import tpu as pltpu


def _round_up(x, m):
    return ((x + m - 1) // m) * m


def _mlp_kernel(x_ref, w1_ref, b1_ref, w2_ref, b2_ref, w3_ref, b3_ref, o_ref):
    # One (TM, latent_dim) activation tile per grid step; all weights stay
    # VMEM-resident. bf16 operands on the MXU, f32 accumulation, f32 bias add.
    x = x_ref[...].astype(jnp.bfloat16)                                     # f32 -> bf16 on-chip

    h1 = jnp.dot(x, w1_ref[...], preferred_element_type=jnp.float32) + b1_ref[...]
    h1 = jnp.maximum(h1, 0.0).astype(jnp.bfloat16)

    h2 = jnp.dot(h1, w2_ref[...], preferred_element_type=jnp.float32) + b2_ref[...]
    h2 = jnp.maximum(h2, 0.0).astype(jnp.bfloat16)

    out = jnp.dot(h2, w3_ref[...], preferred_element_type=jnp.float32) + b3_ref[...]
    o_ref[...] = out.astype(o_ref.dtype)                                    # bf16, lane-dense store


def prepare_params(params):
    """One-time weight prep (do OUTSIDE the per-call forward): bf16 weights for
    the MXU, f32 biases as (1, N), output lane dim padded to a multiple of 128."""
    out_dim = params["w3"].shape[1]
    out_pad = _round_up(max(out_dim, 128), 128)
    w3 = jnp.pad(params["w3"], ((0, 0), (0, out_pad - out_dim)))
    b3 = jnp.pad(params["b3"].reshape(1, -1), ((0, 0), (0, out_pad - out_dim)))
    return {
        "w1": params["w1"].astype(jnp.bfloat16),
        "b1": params["b1"].reshape(1, -1).astype(jnp.float32),
        "w2": params["w2"].astype(jnp.bfloat16),
        "b2": params["b2"].reshape(1, -1).astype(jnp.float32),
        "w3": w3.astype(jnp.bfloat16),
        "b3": b3.astype(jnp.float32),
    }


def _choose_tm(batch):
    # Small batch: latency-bound; one grid step over exactly the real rows
    # (block == full array dim, so no divisibility issue and no padding).
    if batch <= 256:
        return batch
    # Larger batch: full-MXU tiles (multiple of 128 rows), >= 2 grid steps so
    # the "parallel" axis can use both TensorCores on v7x, capped at 1024 rows
    # to stay comfortably inside scoped VMEM on every generation (incl. v5e).
    return min(_round_up(pl.cdiv(batch, 2), 128), 1024)


@functools.partial(jax.jit, static_argnames=("output_dim",))
def classifier_forward(latent, prepared, output_dim):
    """latent: [batch, latent_dim] float32. prepared: output of prepare_params."""
    batch, latent_dim = latent.shape
    h1_dim = prepared["w1"].shape[1]          # 512
    h2_dim = prepared["w2"].shape[1]          # 128
    out_pad = prepared["w3"].shape[1]         # 128 (padded lane dim)

    tm = _choose_tm(batch)
    grid = (pl.cdiv(batch, tm),)              # ragged last tile handled by Pallas masking

    flops = 2 * batch * (latent_dim * h1_dim + h1_dim * h2_dim + h2_dim * out_pad)
    bytes_accessed = (
        latent.size * 4
        + (prepared["w1"].size + prepared["w2"].size + prepared["w3"].size) * 2
        + (prepared["b1"].size + prepared["b2"].size + prepared["b3"].size) * 4
        + batch * out_pad * 2
    )

    out = pl.pallas_call(
        _mlp_kernel,
        out_shape=jax.ShapeDtypeStruct((batch, out_pad), jnp.bfloat16),
        grid_spec=pltpu.PrefetchScalarGridSpec(
            num_scalar_prefetch=0,
            grid=grid,
            in_specs=[
                # streamed f32 activation tile
                pl.BlockSpec((tm, latent_dim), lambda i: (i, 0)),
                # VMEM-resident weights/biases (constant block index -> DMA'd once,
                # revisited on later grid steps without re-fetching)
                pl.BlockSpec((latent_dim, h1_dim), lambda i: (0, 0)),
                pl.BlockSpec((1, h1_dim), lambda i: (0, 0)),
                pl.BlockSpec((h1_dim, h2_dim), lambda i: (0, 0)),
                pl.BlockSpec((1, h2_dim), lambda i: (0, 0)),
                pl.BlockSpec((h2_dim, out_pad), lambda i: (0, 0)),
                pl.BlockSpec((1, out_pad), lambda i: (0, 0)),
            ],
            out_specs=pl.BlockSpec((tm, out_pad), lambda i: (i, 0)),
        ),
        compiler_params=pltpu.CompilerParams(
            dimension_semantics=("parallel",),       # batch tiles independent -> both TCs on v7x
            vmem_limit_bytes=32 * 1024 * 1024,       # headroom for tm up to 1024 on v5e's 16 MiB default
        ),
        cost_estimate=pl.CostEstimate(
            flops=flops, transcendentals=0, bytes_accessed=bytes_accessed
        ),
    )(latent, prepared["w1"], prepared["b1"], prepared["w2"], prepared["b2"],
      prepared["w3"], prepared["b3"])

    return out[:, :output_dim].astype(latent.dtype)


def init_params(key, latent_dim=512, hidden1=512, hidden2=128, output_dim=7):
    """Deterministic PyTorch-style init: U(-1/sqrt(fan_in), 1/sqrt(fan_in))."""
    keys = jax.random.split(key, 6)

    def linear(kw, kb, fan_in, fan_out):
        bound = 1.0 / math.sqrt(fan_in)
        w = jax.random.uniform(kw, (fan_in, fan_out), jnp.float32, -bound, bound)
        b = jax.random.uniform(kb, (fan_out,), jnp.float32, -bound, bound)
        return w, b

    w1, b1 = linear(keys[0], keys[1], latent_dim, hidden1)
    w2, b2 = linear(keys[2], keys[3], hidden1, hidden2)
    w3, b3 = linear(keys[4], keys[5], hidden2, output_dim)
    return {"w1": w1, "b1": b1, "w2": w2, "b2": b2, "w3": w3, "b3": b3}


def _reference_forward(latent, params):
    """Pure-JAX reference of the same bf16-matmul / f32-accumulate math."""
    x = latent.astype(jnp.bfloat16)
    w1 = params["w1"].astype(jnp.bfloat16)
    w2 = params["w2"].astype(jnp.bfloat16)
    w3 = params["w3"].astype(jnp.bfloat16)
    h = jnp.dot(x, w1, preferred_element_type=jnp.float32) + params["b1"]
    h = jnp.maximum(h, 0.0).astype(jnp.bfloat16)
    h = jnp.dot(h, w2, preferred_element_type=jnp.float32) + params["b2"]
    h = jnp.maximum(h, 0.0).astype(jnp.bfloat16)
    return jnp.dot(h, w3, preferred_element_type=jnp.float32) + params["b3"]


if __name__ == "__main__":
    latent_dim = 512
    output_dim = 7

    key = jax.random.PRNGKey(0)
    k_params, k_small, k_big = jax.random.split(key, 3)

    params = init_params(k_params, latent_dim=latent_dim, output_dim=output_dim)
    prepared = prepare_params(params)     # one-time bf16 cast + lane padding (outside the hot path)

    # Small, latency-shaped batch: single grid step, no padding.
    batch = 8
    latent = jax.random.normal(k_small, (batch, latent_dim), dtype=jnp.float32)
    out = jax.block_until_ready(classifier_forward(latent, prepared, output_dim=output_dim))
    ref = _reference_forward(latent, params)
    assert out.shape == (batch, output_dim), out.shape
    assert jnp.allclose(out, ref, atol=2e-2, rtol=2e-2), float(jnp.max(jnp.abs(out - ref)))

    # Ragged multi-tile batch: exercises the 2-step "parallel" grid + masked last tile.
    batch2 = 300
    latent2 = jax.random.normal(k_big, (batch2, latent_dim), dtype=jnp.float32)
    out2 = jax.block_until_ready(classifier_forward(latent2, prepared, output_dim=output_dim))
    ref2 = _reference_forward(latent2, params)
    assert out2.shape == (batch2, output_dim), out2.shape
    assert jnp.allclose(out2, ref2, atol=2e-2, rtol=2e-2), float(jnp.max(jnp.abs(out2 - ref2)))

    print("KERNEL_OK")
</pallas_src>

<mosaic_0001>
module attributes {stable_mosaic.version = 11 : i64} {
  func.func @_mlp_kernel(%arg0: i32, %arg1: memref<8x512xf32, #tpu.memory_space<vmem>>, %arg2: memref<512x512xbf16, #tpu.memory_space<vmem>>, %arg3: memref<1x512xf32, #tpu.memory_space<vmem>>, %arg4: memref<512x128xbf16, #tpu.memory_space<vmem>>, %arg5: memref<1x128xf32, #tpu.memory_space<vmem>>, %arg6: memref<128x128xbf16, #tpu.memory_space<vmem>>, %arg7: memref<1x128xf32, #tpu.memory_space<vmem>>, %arg8: memref<8x128xbf16, #tpu.memory_space<vmem>>) attributes {dimension_semantics = [#tpu.dimension_semantics<parallel>], iteration_bounds = array<i64: 1>, scalar_prefetch = 0 : i64, scratch_operands = 0 : i64, tpu.core_type = #tpu.core_type<tc>, window_params = [{transform_indices = @transform_0, window_bounds = array<i64: 8, 512>}, {pipeline_mode = #tpu.pipeline_mode<synchronous>, transform_indices = @transform_1, window_bounds = array<i64: 512, 512>}, {pipeline_mode = #tpu.pipeline_mode<synchronous>, transform_indices = @transform_2, window_bounds = array<i64: 1, 512>}, {pipeline_mode = #tpu.pipeline_mode<synchronous>, transform_indices = @transform_3, window_bounds = array<i64: 512, 128>}, {pipeline_mode = #tpu.pipeline_mode<synchronous>, transform_indices = @transform_4, window_bounds = array<i64: 1, 128>}, {pipeline_mode = #tpu.pipeline_mode<synchronous>, transform_indices = @transform_5, window_bounds = array<i64: 128, 128>}, {pipeline_mode = #tpu.pipeline_mode<synchronous>, transform_indices = @transform_6, window_bounds = array<i64: 1, 128>}, {transform_indices = @transform_7, window_bounds = array<i64: 8, 128>}]} {
    %c0 = arith.constant 0 : index
    %c0_0 = arith.constant 0 : index
    %0 = vector.load %arg1[%c0, %c0_0] : memref<8x512xf32, #tpu.memory_space<vmem>>, vector<8x512xf32>
    %1 = arith.truncf %0 : vector<8x512xf32> to vector<8x512xbf16>
    %c0_1 = arith.constant 0 : index
    %c0_2 = arith.constant 0 : index
    %2 = vector.load %arg2[%c0_1, %c0_2] : memref<512x512xbf16, #tpu.memory_space<vmem>>, vector<512x512xbf16>
    %cst = arith.constant dense<0.000000e+00> : vector<8x512xf32>
    %3 = tpu.matmul %1, %2, %cst {dimension_numbers = #tpu.dot_dimension_numbers<[1], [0], [0], [1], [0, 0, 1, 1], [], []>} : vector<8x512xbf16>, vector<512x512xbf16>, vector<8x512xf32> -> vector<8x512xf32>
    %c0_3 = arith.constant 0 : index
    %c0_4 = arith.constant 0 : index
    %4 = vector.load %arg3[%c0_3, %c0_4] : memref<1x512xf32, #tpu.memory_space<vmem>>, vector<1x512xf32>
    %5 = vector.broadcast %4 : vector<1x512xf32> to vector<8x512xf32>
    %6 = arith.addf %3, %5 : vector<8x512xf32>
    %cst_5 = arith.constant 0.000000e+00 : f32
    %7 = vector.broadcast %cst_5 : f32 to vector<8x512xf32>
    %8 = arith.maximumf %6, %7 : vector<8x512xf32>
    %9 = arith.truncf %8 : vector<8x512xf32> to vector<8x512xbf16>
    %c0_6 = arith.constant 0 : index
    %c0_7 = arith.constant 0 : index
    %10 = vector.load %arg4[%c0_6, %c0_7] : memref<512x128xbf16, #tpu.memory_space<vmem>>, vector<512x128xbf16>
    %cst_8 = arith.constant dense<0.000000e+00> : vector<8x128xf32>
    %11 = tpu.matmul %9, %10, %cst_8 {dimension_numbers = #tpu.dot_dimension_numbers<[1], [0], [0], [1], [0, 0, 1, 1], [], []>} : vector<8x512xbf16>, vector<512x128xbf16>, vector<8x128xf32> -> vector<8x128xf32>
    %c0_9 = arith.constant 0 : index
    %c0_10 = arith.constant 0 : index
    %12 = vector.load %arg5[%c0_9, %c0_10] : memref<1x128xf32, #tpu.memory_space<vmem>>, vector<1x128xf32>
    %13 = vector.broadcast %12 : vector<1x128xf32> to vector<8x128xf32>
    %14 = arith.addf %11, %13 : vector<8x128xf32>
    %cst_11 = arith.constant 0.000000e+00 : f32
    %15 = vector.broadcast %cst_11 : f32 to vector<8x128xf32>
    %16 = arith.maximumf %14, %15 : vector<8x128xf32>
    %17 = arith.truncf %16 : vector<8x128xf32> to vector<8x128xbf16>
    %c0_12 = arith.constant 0 : index
    %c0_13 = arith.constant 0 : index
    %18 = vector.load %arg6[%c0_12, %c0_13] : memref<128x128xbf16, #tpu.memory_space<vmem>>, vector<128x128xbf16>
    %cst_14 = arith.constant dense<0.000000e+00> : vector<8x128xf32>
    %19 = tpu.matmul %17, %18, %cst_14 {dimension_numbers = #tpu.dot_dimension_numbers<[1], [0], [0], [1], [0, 0, 1, 1], [], []>} : vector<8x128xbf16>, vector<128x128xbf16>, vector<8x128xf32> -> vector<8x128xf32>
    %c0_15 = arith.constant 0 : index
    %c0_16 = arith.constant 0 : index
    %20 = vector.load %arg7[%c0_15, %c0_16] : memref<1x128xf32, #tpu.memory_space<vmem>>, vector<1x128xf32>
    %21 = vector.broadcast %20 : vector<1x128xf32> to vector<8x128xf32>
    %22 = arith.addf %19, %21 : vector<8x128xf32>
    %23 = arith.truncf %22 : vector<8x128xf32> to vector<8x128xbf16>
    %c0_17 = arith.constant 0 : index
    %c0_18 = arith.constant 0 : index
    %24 = vector.load %arg8[%c0_17, %c0_18] : memref<8x128xbf16, #tpu.memory_space<vmem>>, vector<8x128xbf16>
    tpu.vector_store %arg8[%c0_17, %c0_18], %23 {strides = array<i32>} : memref<8x128xbf16, #tpu.memory_space<vmem>>, vector<8x128xbf16>,
    return
  }
  func.func @transform_0(%arg0: i32) -> (i32, i32) {
    %c0_i32 = arith.constant 0 : i32
    %c0_i32_0 = arith.constant 0 : i32
    return %arg0, %c0_i32 : i32, i32
  }
  func.func @transform_1(%arg0: i32) -> (i32, i32) {
    %c0_i32 = arith.constant 0 : i32
    %c0_i32_0 = arith.constant 0 : i32
    %c0_i32_1 = arith.constant 0 : i32
    return %c0_i32, %c0_i32_0 : i32, i32
  }
  func.func @transform_2(%arg0: i32) -> (i32, i32) {
    %c0_i32 = arith.constant 0 : i32
    %c0_i32_0 = arith.constant 0 : i32
    %c0_i32_1 = arith.constant 0 : i32
    return %c0_i32, %c0_i32_0 : i32, i32
  }
  func.func @transform_3(%arg0: i32) -> (i32, i32) {
    %c0_i32 = arith.constant 0 : i32
    %c0_i32_0 = arith.constant 0 : i32
    %c0_i32_1 = arith.constant 0 : i32
    return %c0_i32, %c0_i32_0 : i32, i32
  }
  func.func @transform_4(%arg0: i32) -> (i32, i32) {
    %c0_i32 = arith.constant 0 : i32
    %c0_i32_0 = arith.constant 0 : i32
    %c0_i32_1 = arith.constant 0 : i32
    return %c0_i32, %c0_i32_0 : i32, i32
  }
  func.func @transform_5(%arg0: i32) -> (i32, i32) {
    %c0_i32 = arith.constant 0 : i32
    %c0_i32_0 = arith.constant 0 : i32
    %c0_i32_1 = arith.constant 0 : i32
    return %c0_i32, %c0_i32_0 : i32, i32
  }
  func.func @transform_6(%arg0: i32) -> (i32, i32) {
    %c0_i32 = arith.constant 0 : i32
    %c0_i32_0 = arith.constant 0 : i32
    %c0_i32_1 = arith.constant 0 : i32
    return %c0_i32, %c0_i32_0 : i32, i32
  }
  func.func @transform_7(%arg0: i32) -> (i32, i32) {
    %c0_i32 = arith.constant 0 : i32
    %c0_i32_0 = arith.constant 0 : i32
    return %arg0, %c0_i32 : i32, i32
  }
}

</mosaic_0001>

<bundles_post_ra>
// kernel: classifier_forward.1
= control target key start
LH: loop header
LB: loop body
LE: loop exit
PB: predicated region body
PF: predicated region fallthrough
CT: control target
= control target key end

     0   :  { %12 = vsyncpa [#allocation3], 0  ;;  %s2266_s0 = inlined_call_operand.hbm [shape: f32[8,512], index: 0, kind: input, shape index: {}]   ;;  %s2267_s1 = inlined_call_operand.hbm [shape: bf16[512,512], index: 1, kind: input, shape index: {}]   ;;  %s2268_s2 = inlined_call_operand.hbm [shape: f32[1,512], index: 2, kind: input, shape index: {}]   ;;  %s2269_s3 = inlined_call_operand.hbm [shape: bf16[512,128], index: 3, kind: input, shape index: {}]   ;;  %s2270_s4 = inlined_call_operand.vmem [shape: f32[1,128], index: 4, kind: input, shape index: {}]   ;;  %s2271_s5 = inlined_call_operand.hbm [shape: bf16[128,128], index: 5, kind: input, shape index: {}]   ;;  %s2272_s6 = inlined_call_operand.vmem [shape: f32[1,128], index: 6, kind: input, shape index: {}]   ;;  %s2273_s7 = inlined_call_operand.vmem [shape: bf16[8,128], index: 7, kind: output, shape index: {}]  }
   0x1   :  { %13 = vsyncpa [#allocation5], 0 }
   0x2   :  { %14 = vsyncpa [#allocation8], 0  ;;  %s2140_s24 = smov [#allocation4]   ;;  %s2024_s28 = scalar_lea.hbm %s2267_s1, 16384 }
   0x3   :  { %s30_s25 = sshll.u32 %s2140_s24, 4  ;;  %p2025_p0 = scmp.ne.s32.totalorder %s2267_s1, %s2024_s28  ;;  %s31_s25 = int_to_ptr.vmem [resolvable:$true] %s30_s25 }
   0x4   :  { %p2028_p1 = scmp.lt.u32.totalorder %s2024_s28, %s2267_s1 }
   0x6   :  { %p2030_p2 = pnand %p2028_p1, %p2025_p0 }
   0x8   :  { %2033 = shalt.err (!%p2030_p2)
}
   0x9   :  { %s2034_s10 = scalar_lea.vmem %s31_s25, 16384  ;;  %p2039_p4 = scmp.lt.s32.totalorder %s31_s25, %s31_s25 }
   0xa   :  { %p2035_p3 = scmp.ne.s32.totalorder %s31_s25, %s2034_s10  ;;  %p2040_p5 = scmp.lt.s32.totalorder %s2034_s10, %s2034_s10 }
   0xc   :  { %p2041_p6 = por %p2040_p5, %p2039_p4 }
   0xe   :  { %p2042_p7 = pnand %p2041_p6, %p2035_p3 }
  0x10   :  { %2045 = shalt.err (!%p2042_p7)
}
  0x11   :  { %s2141_s11 = smov 256   ;;  %s2142_s12 = smov 16  }
  0x12   :  { %36 = dma.hbm_to_vmem [thread:$0]  %s2267_s1, 16384, %s31_s25, [#allocation5], %s2141_s11, %s2141_s11, %s2142_s12  }
  0x13   :  { %s2143_s15 = smov [#allocation7]   ;;  %s2046_s19 = scalar_lea.hbm %s2269_s3, 4096 }
  0x14   :  { %s52_s16 = sshll.u32 %s2143_s15, 4  ;;  %p2047_p8 = scmp.ne.s32.totalorder %s2269_s3, %s2046_s19  ;;  %s53_s16 = int_to_ptr.vmem [resolvable:$true] %s52_s16 }
  0x15   :  { %p2050_p9 = scmp.lt.u32.totalorder %s2046_s19, %s2269_s3 }
  0x17   :  { %p2052_p10 = pnand %p2050_p9, %p2047_p8 }
  0x19   :  { %2055 = shalt.err (!%p2052_p10)
}
  0x1a   :  { %s2056_s24 = scalar_lea.vmem %s53_s16, 4096  ;;  %p2061_p12 = scmp.lt.s32.totalorder %s53_s16, %s53_s16 }
  0x1b   :  { %p2057_p11 = scmp.ne.s32.totalorder %s53_s16, %s2056_s24  ;;  %p2062_p13 = scmp.lt.s32.totalorder %s2056_s24, %s2056_s24 }
  0x1d   :  { %p2063_p0 = por %p2062_p13, %p2061_p12 }
  0x1f   :  { %p2064_p1 = pnand %p2063_p0, %p2057_p11 }
  0x21   :  { %2067 = shalt.err (!%p2064_p1)
}
  0x22   :  { %s2144_s1 = smov 64   ;;  %s2145_s25 = smov 4  }
  0x23   :  { %58 = dma.hbm_to_vmem [thread:$0]  %s2269_s3, 4096, %s53_s16, [#allocation8], %s2144_s1, %s2144_s1, %s2145_s25  }
  0x24   :  { %s2146_s28 = smov [#allocation2]   ;;  %s2147_s30 = smov [#allocation6]  }
  0x25   :  { %s21_s29 = sshll.u32 %s2146_s28, 4  ;;  %s43_s8 = sshll.u32 %s2147_s30, 4  ;;  %s22_s29 = int_to_ptr.vmem [resolvable:$true] %s21_s29  ;;  %s44_s8 = int_to_ptr.vmem [resolvable:$true] %s43_s8 }
  0x26   :  { %s2068_s11 = scalar_lea.hbm %s2266_s0, 512 }
  0x27   :  { %p2069_p2 = scmp.ne.s32.totalorder %s2266_s0, %s2068_s11  ;;  %p2072_p3 = scmp.lt.u32.totalorder %s2068_s11, %s2266_s0 }
  0x29   :  { %p2074_p4 = pnand %p2072_p3, %p2069_p2 }
  0x2b   :  { %2077 = shalt.err (!%p2074_p4)
}
  0x2c   :  { %s2078_s3 = scalar_lea.vmem %s22_s29, 512  ;;  %p2083_p6 = scmp.lt.s32.totalorder %s22_s29, %s22_s29 }
  0x2d   :  { %p2079_p5 = scmp.ne.s32.totalorder %s22_s29, %s2078_s3  ;;  %p2084_p7 = scmp.lt.s32.totalorder %s2078_s3, %s2078_s3 }
  0x2f   :  { %p2085_p8 = por %p2084_p7, %p2083_p6 }
  0x31   :  { %p2086_p9 = pnand %p2085_p8, %p2079_p5 }
  0x33   :  { %2089 = shalt.err (!%p2086_p9)
}
  0x34   :  { %24 = dma.hbm_to_vmem [thread:$0]  %s2266_s0, 512, %s22_s29, [#allocation3]  }
  0x35   :  { %s2090_s20 = scalar_lea.hbm %s2268_s2, 64 }
  0x36   :  { %p2091_p10 = scmp.ne.s32.totalorder %s2268_s2, %s2090_s20  ;;  %p2094_p11 = scmp.lt.u32.totalorder %s2090_s20, %s2268_s2 }
  0x38   :  { %p2096_p12 = pnand %p2094_p11, %p2091_p10 }
  0x3a   :  { %2099 = shalt.err (!%p2096_p12)
}
  0x3b   :  { %s2100_s26 = scalar_lea.vmem %s44_s8, 64  ;;  %p2105_p0 = scmp.lt.s32.totalorder %s44_s8, %s44_s8 }
  0x3c   :  { %p2101_p13 = scmp.ne.s32.totalorder %s44_s8, %s2100_s26  ;;  %p2106_p1 = scmp.lt.s32.totalorder %s2100_s26, %s2100_s26 }
  0x3e   :  { %p2107_p2 = por %p2106_p1, %p2105_p0 }
  0x40   :  { %p2108_p3 = pnand %p2107_p2, %p2101_p13 }
  0x42   :  { %2111 = shalt.err (!%p2108_p3)
}
  0x43   :  { %46 = dma.hbm_to_vmem [thread:$0]  %s2268_s2, 64, %s44_s8, [#allocation5]  }
  0x44   :  { %s2148_s28 = smov [#allocation9]   ;;  %s2112_s10 = scalar_lea.hbm %s2271_s5, 1024 }
  0x45   :  { %s66_s29 = sshll.u32 %s2148_s28, 4  ;;  %p2113_p4 = scmp.ne.s32.totalorder %s2271_s5, %s2112_s10  ;;  %s67_s29 = int_to_ptr.vmem [resolvable:$true] %s66_s29 }
  0x46   :  { %p2116_p5 = scmp.lt.u32.totalorder %s2112_s10, %s2271_s5 }
  0x48   :  { %p2118_p6 = pnand %p2116_p5, %p2113_p4 }
  0x4a   :  { %2121 = shalt.err (!%p2118_p6)
}
  0x4b   :  { %s2122_s15 = scalar_lea.vmem %s67_s29, 1024  ;;  %p2127_p8 = scmp.lt.s32.totalorder %s67_s29, %s67_s29 }
  0x4c   :  { %p2123_p7 = scmp.ne.s32.totalorder %s67_s29, %s2122_s15  ;;  %p2128_p9 = scmp.lt.s32.totalorder %s2122_s15, %s2122_s15 }
  0x4e   :  { %p2129_p10 = por %p2128_p9, %p2127_p8 }
  0x50   :  { %p2130_p11 = pnand %p2129_p10, %p2123_p7 }
  0x52   :  { %2133 = shalt.err (!%p2130_p11)
}
  0x53   :  { %72 = dma.hbm_to_vmem [thread:$0]  %s2271_s5, 1024, %s67_s29, [#allocation8], %s2144_s1, %s2144_s1, %s2145_s25  }
  0x54   :  { %2134 = dma.done.wait [#allocation3], 512  }
  0x55   :  { %2135 = vsyncadd [#allocation3], 4294966784 }
  0x56   :  { %2136 = dma.done.wait [#allocation5], 16448  }
  0x57   :  { %2137 = vsyncadd [#allocation5], 4294950848 }
  0x58   :  { %2138 = dma.done.wait [#allocation8], 5120  }
  0x59   :  { %2139 = vsyncadd [#allocation8], 4294962176  ;;  %v1792_v0 = vld [vmem:[#allocation4 + $0x4] ss:$16 sps:$4 sm:$0xff]   ;;  %v1794_v1 = vld [vmem:[#allocation4 + $0xc] ss:$16 sps:$4 sm:$0xff]  }
  0x5a   :  { %889 = vmatprep.subr.bf16.mxu0 %v1792_v0  ;;  %v1796_v2 = vld [vmem:[#allocation4] ss:$16 sps:$4 sm:$0xff]   ;;  %v1797_v3 = vld [vmem:[#allocation4 + $0x8] ss:$16 sps:$4 sm:$0xff]   ;;  %971 = vmatprep.subr.bf16.mxu1 %v1794_v1  ;;  %v1798_v4 = vld [vmem:[#allocation4 + $0x24] ss:$16 sps:$4 sm:$0xff]  }
  0x5b   :  { %890 = vmatpush1.bf16.msra.mxu0 %v1796_v2  ;;  %972 = vmatpush1.bf16.msra.mxu1 %v1797_v3  ;;  %v1800_v5 = vld [vmem:[#allocation4 + $0x2c] ss:$16 sps:$4 sm:$0xff]   ;;  %v1802_v6 = vld [vmem:[#allocation4 + $0x20] ss:$16 sps:$4 sm:$0xff]   ;;  %v1803_v7 = vld [vmem:[#allocation4 + $0x28] ss:$16 sps:$4 sm:$0xff]  }
  0x5c   :  { %891 = vmatprep.subr.bf16.mxu0 %v1798_v4  ;;  %973 = vmatprep.subr.bf16.mxu1 %v1800_v5  ;;  %v1804_v8 = vld [vmem:[#allocation4 + $0x44] ss:$16 sps:$4 sm:$0xff]   ;;  %v1806_v9 = vld [vmem:[#allocation4 + $0x4c] ss:$16 sps:$4 sm:$0xff]   ;;  %v1808_v10 = vld [vmem:[#allocation4 + $0x40] ss:$16 sps:$4 sm:$0xff]  }
  0x5d   :  { %v1809_v11 = vld [vmem:[#allocation4 + $0x48] ss:$16 sps:$4 sm:$0xff]   ;;  %v1810_v12 = vld [vmem:[#allocation4 + $0x64] ss:$16 sps:$4 sm:$0xff]   ;;  %v1812_v13 = vld [vmem:[#allocation4 + $0x6c] ss:$16 sps:$4 sm:$0xff]  }
  0x5e   :  { %v1814_v14 = vld [vmem:[#allocation4 + $0x60] ss:$16 sps:$4 sm:$0xff]   ;;  %v1815_v15 = vld [vmem:[#allocation4 + $0x68] ss:$16 sps:$4 sm:$0xff]   ;;  %v1816_v16 = vld [vmem:[#allocation4 + $0x84] ss:$16 sps:$4 sm:$0xff]  }
  0x5f   :  { %892 = vmatpush1.bf16.msra.mxu0 %v1802_v6  ;;  %974 = vmatpush1.bf16.msra.mxu1 %v1803_v7  ;;  %v1818_v17 = vld [vmem:[#allocation4 + $0x8c] ss:$16 sps:$4 sm:$0xff]   ;;  %v1820_v18 = vld [vmem:[#allocation4 + $0x80] ss:$16 sps:$4 sm:$0xff]   ;;  %v1821_v19 = vld [vmem:[#allocation4 + $0x88] ss:$16 sps:$4 sm:$0xff]  }
  0x60   :  { %893 = vmatprep.subr.bf16.mxu0 %v1804_v8  ;;  %975 = vmatprep.subr.bf16.mxu1 %v1806_v9  ;;  %v1822_v20 = vld [vmem:[#allocation4 + $0xa4] ss:$16 sps:$4 sm:$0xff]   ;;  %v1824_v21 = vld [vmem:[#allocation4 + $0xac] ss:$16 sps:$4 sm:$0xff]   ;;  %v1826_v22 = vld [vmem:[#allocation4 + $0xa0] ss:$16 sps:$4 sm:$0xff]  }
  0x61   :  { %v1827_v23 = vld [vmem:[#allocation4 + $0xa8] ss:$16 sps:$4 sm:$0xff]   ;;  %v1828_v24 = vld [vmem:[#allocation4 + $0xc4] ss:$16 sps:$4 sm:$0xff]   ;;  %v1830_v25 = vld [vmem:[#allocation4 + $0xcc] ss:$16 sps:$4 sm:$0xff]  }
  0x62   :  { %v1832_v26 = vld [vmem:[#allocation4 + $0xc0] ss:$16 sps:$4 sm:$0xff]   ;;  %v1833_v27 = vld [vmem:[#allocation4 + $0xc8] ss:$16 sps:$4 sm:$0xff]   ;;  %v1834_v28 = vld [vmem:[#allocation4 + $0xe4] ss:$16 sps:$4 sm:$0xff]  }
  0x63   :  { %894 = vmatpush1.bf16.msra.mxu0 %v1808_v10  ;;  %976 = vmatpush1.bf16.msra.mxu1 %v1809_v11  ;;  %v1836_v29 = vld [vmem:[#allocation4 + $0xec] ss:$16 sps:$4 sm:$0xff]   ;;  %v1838_v30 = vld [vmem:[#allocation4 + $0xe0] ss:$16 sps:$4 sm:$0xff]   ;;  %v1839_v31 = vld [vmem:[#allocation4 + $0xe8] ss:$16 sps:$4 sm:$0xff]  }
  0x64   :  { %895 = vmatprep.subr.bf16.mxu0 %v1810_v12  ;;  %977 = vmatprep.subr.bf16.mxu1 %v1812_v13  ;;  %v1840_v32 = vld [vmem:[#allocation4 + $0x104] ss:$16 sps:$4 sm:$0xff]   ;;  %v1842_v33 = vld [vmem:[#allocation4 + $0x10c] ss:$16 sps:$4 sm:$0xff]   ;;  %v1844_v34 = vld [vmem:[#allocation4 + $0x100] ss:$16 sps:$4 sm:$0xff]  }
  0x65   :  { %v1845_v35 = vld [vmem:[#allocation4 + $0x108] ss:$16 sps:$4 sm:$0xff]   ;;  %v1846_v36 = vld [vmem:[#allocation4 + $0x124] ss:$16 sps:$4 sm:$0xff]   ;;  %v1848_v37 = vld [vmem:[#allocation4 + $0x12c] ss:$16 sps:$4 sm:$0xff]  }
  0x66   :  { %v1850_v38 = vld [vmem:[#allocation4 + $0x120] ss:$16 sps:$4 sm:$0xff]   ;;  %v1851_v39 = vld [vmem:[#allocation4 + $0x128] ss:$16 sps:$4 sm:$0xff]   ;;  %v1852_v40 = vld [vmem:[#allocation4 + $0x144] ss:$16 sps:$4 sm:$0xff]  }
  0x67   :  { %896 = vmatpush1.bf16.msra.mxu0 %v1814_v14  ;;  %978 = vmatpush1.bf16.msra.mxu1 %v1815_v15  ;;  %v1854_v41 = vld [vmem:[#allocation4 + $0x14c] ss:$16 sps:$4 sm:$0xff]   ;;  %v1856_v42 = vld [vmem:[#allocation4 + $0x140] ss:$16 sps:$4 sm:$0xff]   ;;  %v1857_v43 = vld [vmem:[#allocation4 + $0x148] ss:$16 sps:$4 sm:$0xff]  }
  0x68   :  { %897 = vmatprep.subr.bf16.mxu0 %v1816_v16  ;;  %979 = vmatprep.subr.bf16.mxu1 %v1818_v17  ;;  %v1858_v44 = vld [vmem:[#allocation4 + $0x164] ss:$16 sps:$4 sm:$0xff]   ;;  %v1860_v45 = vld [vmem:[#allocation4 + $0x16c] ss:$16 sps:$4 sm:$0xff]   ;;  %v1862_v47 = vld [vmem:[#allocation4 + $0x160] ss:$16 sps:$4 sm:$0xff]  }
  0x69   :  { %v92_v46 = vld [vmem:[#allocation2 + $0x8] sm:$0xff]  ;;  %v1864_v50 = vld [vmem:[#allocation4 + $0x184] ss:$16 sps:$4 sm:$0xff]   ;;  %v1868_v52 = vld [vmem:[#allocation4 + $0x180] ss:$16 sps:$4 sm:$0xff]   ;;  %vm2150_vm0 = vmmov 0  }
  0x6a   :  { %v96_v48 = vpack.c.bf16 %v92_v46, %v92_v46  ;;  %v1863_v49 = vld [vmem:[#allocation4 + $0x168] ss:$16 sps:$4 sm:$0xff]   ;;  %v1866_v51 = vld [vmem:[#allocation4 + $0x18c] ss:$16 sps:$4 sm:$0xff]   ;;  %v1870_v54 = vld [vmem:[#allocation4 + $0x1a4] ss:$16 sps:$4 sm:$0xff]  }
  0x6b   :  { %898 = vmatpush1.bf16.msra.mxu0 %v1820_v18  ;;  %980 = vmatpush1.bf16.msra.mxu1 %v1821_v19  ;;  %v1869_v53 = vld [vmem:[#allocation4 + $0x188] ss:$16 sps:$4 sm:$0xff]   ;;  %v1872_v55 = vld [vmem:[#allocation4 + $0x1ac] ss:$16 sps:$4 sm:$0xff]   ;;  %v1874_v56 = vld [vmem:[#allocation4 + $0x1a0] ss:$16 sps:$4 sm:$0xff]  }
  0x6c   :  { %899 = vmatprep.subr.bf16.mxu0 %v1822_v20  ;;  %981 = vmatprep.subr.bf16.mxu1 %v1824_v21  ;;  %v1875_v57 = vld [vmem:[#allocation4 + $0x1a8] ss:$16 sps:$4 sm:$0xff]   ;;  %v1876_v58 = vld [vmem:[#allocation4 + $0x1c4] ss:$16 sps:$4 sm:$0xff]   ;;  %v1878_v59 = vld [vmem:[#allocation4 + $0x1cc] ss:$16 sps:$4 sm:$0xff]  }
  0x6d   :  { %921 = vmatprep.mubr.bf16.mxu0 %v96_v48  ;;  %1003 = vmatprep.mubr.bf16.mxu1 %v96_v48  ;;  %v1880_v60 = vld [vmem:[#allocation4 + $0x1c0] ss:$16 sps:$4 sm:$0xff]   ;;  %v1881_v61 = vld [vmem:[#allocation4 + $0x1c8] ss:$16 sps:$4 sm:$0xff]   ;;  %v1882_v62 = vld [vmem:[#allocation4 + $0x1e4] ss:$16 sps:$4 sm:$0xff]  }
  0x6e   :  { %v1884_v63 = vld [vmem:[#allocation4 + $0x1ec] ss:$16 sps:$4 sm:$0xff]   ;;  %v1886_v0 = vld [vmem:[#allocation4 + $0x1e0] ss:$16 sps:$4 sm:$0xff]   ;;  %v1887_v1 = vld [vmem:[#allocation4 + $0x1e8] ss:$16 sps:$4 sm:$0xff]  }
  0x6f   :  { %900 = vmatpush1.bf16.msra.mxu0 %v1826_v22  ;;  %982 = vmatpush1.bf16.msra.mxu1 %v1827_v23  ;;  %v91_v2 = vld [vmem:[#allocation2] sm:$0xff]  ;;  %v1893_v4 = vld [vmem:[#allocation4 + $0x20c] ss:$16 sps:$4 sm:$0xff]   ;;  %v1891_v7 = vld [vmem:[#allocation4 + $0x208] ss:$16 sps:$4 sm:$0xff]  }
  0x70   :  { %901 = vmatprep.subr.bf16.mxu0 %v1828_v24  ;;  %983 = vmatprep.subr.bf16.mxu1 %v1830_v25  ;;  %v1890_v3 = vld [vmem:[#allocation4 + $0x204] ss:$16 sps:$4 sm:$0xff]   ;;  %v95_v5 = vpack.c.bf16 %v91_v2, %v91_v2  ;;  %v1888_v6 = vld [vmem:[#allocation4 + $0x200] ss:$16 sps:$4 sm:$0xff]   ;;  %v1899_v9 = vld [vmem:[#allocation4 + $0x22c] ss:$16 sps:$4 sm:$0xff]  }
  0x71   :  { %v1896_v8 = vld [vmem:[#allocation4 + $0x224] ss:$16 sps:$4 sm:$0xff]   ;;  %v1894_v10 = vld [vmem:[#allocation4 + $0x220] ss:$16 sps:$4 sm:$0xff]   ;;  %v1897_v11 = vld [vmem:[#allocation4 + $0x228] ss:$16 sps:$4 sm:$0xff]  }
  0x72   :  { %v1902_v12 = vld [vmem:[#allocation4 + $0x244] ss:$16 sps:$4 sm:$0xff]   ;;  %v1905_v13 = vld [vmem:[#allocation4 + $0x24c] ss:$16 sps:$4 sm:$0xff]   ;;  %v1900_v14 = vld [vmem:[#allocation4 + $0x240] ss:$16 sps:$4 sm:$0xff]  }
  0x73   :  { %902 = vmatpush1.bf16.msra.mxu0 %v1832_v26  ;;  %984 = vmatpush1.bf16.msra.mxu1 %v1833_v27  ;;  %v1903_v15 = vld [vmem:[#allocation4 + $0x248] ss:$16 sps:$4 sm:$0xff]   ;;  %v1908_v16 = vld [vmem:[#allocation4 + $0x264] ss:$16 sps:$4 sm:$0xff]   ;;  %v1911_v17 = vld [vmem:[#allocation4 + $0x26c] ss:$16 sps:$4 sm:$0xff]  }
  0x74   :  { %903 = vmatprep.subr.bf16.mxu0 %v1834_v28  ;;  %985 = vmatprep.subr.bf16.mxu1 %v1836_v29  ;;  %v1906_v18 = vld [vmem:[#allocation4 + $0x260] ss:$16 sps:$4 sm:$0xff]   ;;  %v1909_v19 = vld [vmem:[#allocation4 + $0x268] ss:$16 sps:$4 sm:$0xff]   ;;  %v1914_v20 = vld [vmem:[#allocation4 + $0x284] ss:$16 sps:$4 sm:$0xff]  }
  0x75   :  { %v1917_v21 = vld [vmem:[#allocation4 + $0x28c] ss:$16 sps:$4 sm:$0xff]   ;;  %v1912_v22 = vld [vmem:[#allocation4 + $0x280] ss:$16 sps:$4 sm:$0xff]   ;;  %v1915_v23 = vld [vmem:[#allocation4 + $0x288] ss:$16 sps:$4 sm:$0xff]  }
  0x76   :  { %v1920_v24 = vld [vmem:[#allocation4 + $0x2a4] ss:$16 sps:$4 sm:$0xff]   ;;  %v1923_v25 = vld [vmem:[#allocation4 + $0x2ac] ss:$16 sps:$4 sm:$0xff]   ;;  %v1918_v26 = vld [vmem:[#allocation4 + $0x2a0] ss:$16 sps:$4 sm:$0xff]  }
  0x77   :  { %904 = vmatpush1.bf16.msra.mxu0 %v1838_v30  ;;  %986 = vmatpush1.bf16.msra.mxu1 %v1839_v31  ;;  %v1921_v27 = vld [vmem:[#allocation4 + $0x2a8] ss:$16 sps:$4 sm:$0xff]   ;;  %v1926_v28 = vld [vmem:[#allocation4 + $0x2c4] ss:$16 sps:$4 sm:$0xff]   ;;  %v1929_v29 = vld [vmem:[#allocation4 + $0x2cc] ss:$16 sps:$4 sm:$0xff]  }
  0x78   :  { %905 = vmatprep.subr.bf16.mxu0 %v1840_v32  ;;  %987 = vmatprep.subr.bf16.mxu1 %v1842_v33  ;;  %v1924_v30 = vld [vmem:[#allocation4 + $0x2c0] ss:$16 sps:$4 sm:$0xff]   ;;  %v94_v31 = vld [vmem:[#allocation2 + $0x18] sm:$0xff]  ;;  %v1950_v46 = vld [vmem:[#allocation4 + $0x344] ss:$16 sps:$4 sm:$0xff]  }
  0x79   :  { %v1927_v32 = vld [vmem:[#allocation4 + $0x2c8] ss:$16 sps:$4 sm:$0xff]   ;;  %v98_v33 = vpack.c.bf16 %v94_v31, %v94_v31  ;;  %v1948_v48 = vld [vmem:[#allocation4 + $0x340] ss:$16 sps:$4 sm:$0xff]   ;;  %v1980_v2 = vld [vmem:[#allocation4 + $0x3e4] ss:$16 sps:$4 sm:$0xff]  }
  0x7a   :  { %v2007_v31 = vld [vmem:[#allocation7 + $0xa8] sm:$0xff]  }
  0x7b   :  { %906 = vmatpush1.bf16.msra.mxu0 %v1844_v34  ;;  %988 = vmatpush1.bf16.msra.mxu1 %v1845_v35  ;;  %v1932_v34 = vld [vmem:[#allocation4 + $0x2e4] ss:$16 sps:$4 sm:$0xff]   ;;  %v1935_v35 = vld [vmem:[#allocation4 + $0x2ec] ss:$16 sps:$4 sm:$0xff]  }
  0x7c   :  { %907 = vmatprep.subr.bf16.mxu0 %v1846_v36  ;;  %989 = vmatprep.subr.bf16.mxu1 %v1848_v37  ;;  %v1930_v36 = vld [vmem:[#allocation4 + $0x2e0] ss:$16 sps:$4 sm:$0xff]   ;;  %v1933_v37 = vld [vmem:[#allocation4 + $0x2e8] ss:$16 sps:$4 sm:$0xff]  }
  0x7f   :  { %908 = vmatpush1.bf16.msra.mxu0 %v1850_v38  ;;  %990 = vmatpush1.bf16.msra.mxu1 %v1851_v39  ;;  %v1938_v38 = vld [vmem:[#allocation4 + $0x304] ss:$16 sps:$4 sm:$0xff]   ;;  %v1941_v39 = vld [vmem:[#allocation4 + $0x30c] ss:$16 sps:$4 sm:$0xff]  }
  0x80   :  { %909 = vmatprep.subr.bf16.mxu0 %v1852_v40  ;;  %991 = vmatprep.subr.bf16.mxu1 %v1854_v41  ;;  %v1936_v40 = vld [vmem:[#allocation4 + $0x300] ss:$16 sps:$4 sm:$0xff]   ;;  %v1939_v41 = vld [vmem:[#allocation4 + $0x308] ss:$16 sps:$4 sm:$0xff]  }
  0x83   :  { %910 = vmatpush1.bf16.msra.mxu0 %v1856_v42  ;;  %992 = vmatpush1.bf16.msra.mxu1 %v1857_v43  ;;  %v1944_v42 = vld [vmem:[#allocation4 + $0x324] ss:$16 sps:$4 sm:$0xff]   ;;  %v1947_v43 = vld [vmem:[#allocation4 + $0x32c] ss:$16 sps:$4 sm:$0xff]  }
  0x84   :  { %911 = vmatprep.subr.bf16.mxu0 %v1858_v44  ;;  %993 = vmatprep.subr.bf16.mxu1 %v1860_v45  ;;  %v1942_v44 = vld [vmem:[#allocation4 + $0x320] ss:$16 sps:$4 sm:$0xff]   ;;  %v1945_v45 = vld [vmem:[#allocation4 + $0x328] ss:$16 sps:$4 sm:$0xff]  }
  0x87   :  { %912 = vmatpush1.bf16.msra.mxu0 %v1862_v47  ;;  %994 = vmatpush1.bf16.msra.mxu1 %v1863_v49  ;;  %v1953_v47 = vld [vmem:[#allocation4 + $0x34c] ss:$16 sps:$4 sm:$0xff]   ;;  %v1951_v49 = vld [vmem:[#allocation4 + $0x348] ss:$16 sps:$4 sm:$0xff]  }
  0x88   :  { %913 = vmatprep.subr.bf16.mxu0 %v1864_v50  ;;  %995 = vmatprep.subr.bf16.mxu1 %v1866_v51  ;;  %v1956_v50 = vld [vmem:[#allocation4 + $0x364] ss:$16 sps:$4 sm:$0xff]   ;;  %v1959_v51 = vld [vmem:[#allocation4 + $0x36c] ss:$16 sps:$4 sm:$0xff]  }
  0x8b   :  { %914 = vmatpush1.bf16.msra.mxu0 %v1868_v52  ;;  %996 = vmatpush1.bf16.msra.mxu1 %v1869_v53  ;;  %v1954_v52 = vld [vmem:[#allocation4 + $0x360] ss:$16 sps:$4 sm:$0xff]   ;;  %v1957_v53 = vld [vmem:[#allocation4 + $0x368] ss:$16 sps:$4 sm:$0xff]  }
  0x8c   :  { %915 = vmatprep.subr.bf16.mxu0 %v1870_v54  ;;  %997 = vmatprep.subr.bf16.mxu1 %v1872_v55  ;;  %v1962_v54 = vld [vmem:[#allocation4 + $0x384] ss:$16 sps:$4 sm:$0xff]   ;;  %v1965_v55 = vld [vmem:[#allocation4 + $0x38c] ss:$16 sps:$4 sm:$0xff]  }
  0x8f   :  { %916 = vmatpush1.bf16.msra.mxu0 %v1874_v56  ;;  %998 = vmatpush1.bf16.msra.mxu1 %v1875_v57  ;;  %v1960_v56 = vld [vmem:[#allocation4 + $0x380] ss:$16 sps:$4 sm:$0xff]   ;;  %v1963_v57 = vld [vmem:[#allocation4 + $0x388] ss:$16 sps:$4 sm:$0xff]  }
  0x90   :  { %917 = vmatprep.subr.bf16.mxu0 %v1876_v58  ;;  %999 = vmatprep.subr.bf16.mxu1 %v1878_v59  ;;  %v1968_v58 = vld [vmem:[#allocation4 + $0x3a4] ss:$16 sps:$4 sm:$0xff]   ;;  %v1971_v59 = vld [vmem:[#allocation4 + $0x3ac] ss:$16 sps:$4 sm:$0xff]  }
  0x93   :  { %918 = vmatpush1.bf16.msra.mxu0 %v1880_v60  ;;  %1000 = vmatpush1.bf16.msra.mxu1 %v1881_v61  ;;  %v1966_v60 = vld [vmem:[#allocation4 + $0x3a0] ss:$16 sps:$4 sm:$0xff]   ;;  %v1969_v61 = vld [vmem:[#allocation4 + $0x3a8] ss:$16 sps:$4 sm:$0xff]  }
  0x94   :  { %919 = vmatprep.subr.bf16.mxu0 %v1882_v62  ;;  %1001 = vmatprep.subr.bf16.mxu1 %v1884_v63  ;;  %v1974_v62 = vld [vmem:[#allocation4 + $0x3c4] ss:$16 sps:$4 sm:$0xff]   ;;  %v1977_v63 = vld [vmem:[#allocation4 + $0x3cc] ss:$16 sps:$4 sm:$0xff]  }
  0x97   :  { %920 = vmatpush1.bf16.msra.mxu0 %v1886_v0  ;;  %1002 = vmatpush1.bf16.msra.mxu1 %v1887_v1  ;;  %v1972_v0 = vld [vmem:[#allocation4 + $0x3c0] ss:$16 sps:$4 sm:$0xff]   ;;  %v1975_v1 = vld [vmem:[#allocation4 + $0x3c8] ss:$16 sps:$4 sm:$0xff]  }
  0x98   :  { %930 = vmatprep.subr.bf16.mxu0 %v1890_v3  ;;  %1012 = vmatprep.subr.bf16.mxu1 %v1893_v4  ;;  %v1983_v3 = vld [vmem:[#allocation4 + $0x3ec] ss:$16 sps:$4 sm:$0xff]   ;;  %v1978_v4 = vld [vmem:[#allocation4 + $0x3e0] ss:$16 sps:$4 sm:$0xff]  }
  0x9a   :  { %922 = vmatmul.mubr.bf16.vlgmr.msra.gmra.mrb[0].mxu0 %v95_v5  ;;  %1004 = vmatmul.mubr.bf16.vlgmr.msra.gmra.mrb[0].mxu1 %v95_v5  ;;  %v1981_v5 = vld [vmem:[#allocation4 + $0x3e8] ss:$16 sps:$4 sm:$0xff]  }
  0x9b   :  { %931 = vmatpush1.bf16.msra.mxu0 %v1888_v6  ;;  %1013 = vmatpush1.bf16.msra.mxu1 %v1891_v7  ;;  %v93_v6 = vld [vmem:[#allocation2 + $0x10] sm:$0xff]  ;;  %v1984_v7 = vld [vmem:[#allocation7 + $0x40] sm:$0xff]  }
  0x9c   :  { %932 = vmatprep.subr.bf16.mxu0 %v1896_v8  ;;  %1014 = vmatprep.subr.bf16.mxu1 %v1899_v9  ;;  %v1985_v8 = vld [vmem:[#allocation7 + $0xc0] sm:$0xff]   ;;  %v97_v9 = vpack.c.bf16 %v93_v6, %v93_v6 }
  0x9d   :  { %962 = vmatprep.mubr.bf16.mxu0 %v98_v33  ;;  %1044 = vmatprep.mubr.bf16.mxu1 %v98_v33  ;;  %v2009_v33 = vld [vmem:[#allocation7 + $0xf0] sm:$0xff]   ;;  %v2016_v6 = vld [vmem:[#allocation9] sm:$0xff]  }
  0x9f   :  { %933 = vmatpush1.bf16.msra.mxu0 %v1894_v10  ;;  %1015 = vmatpush1.bf16.msra.mxu1 %v1897_v11  ;;  %v1986_v10 = vld [vmem:[#allocation7] sm:$0xff]  }
  0xa0   :  { %934 = vmatprep.subr.bf16.mxu0 %v1902_v12  ;;  %1016 = vmatprep.subr.bf16.mxu1 %v1905_v13  ;;  %v1987_v11 = vld [vmem:[#allocation7 + $0x80] sm:$0xff]   ;;  %v1988_v12 = vld [vmem:[#allocation7 + $0x48] sm:$0xff]  }
  0xa1   :  { %v1989_v13 = vld [vmem:[#allocation7 + $0xc8] sm:$0xff]  }
  0xa3   :  { %935 = vmatpush1.bf16.msra.mxu0 %v1900_v14  ;;  %1017 = vmatpush1.bf16.msra.mxu1 %v1903_v15  ;;  %v1990_v14 = vld [vmem:[#allocation7 + $0x8] sm:$0xff]  }
  0xa4   :  { %936 = vmatprep.subr.bf16.mxu0 %v1908_v16  ;;  %1018 = vmatprep.subr.bf16.mxu1 %v1911_v17  ;;  %v1991_v15 = vld [vmem:[#allocation7 + $0x88] sm:$0xff]   ;;  %v1992_v16 = vld [vmem:[#allocation7 + $0x50] sm:$0xff]  }
  0xa5   :  { %v1993_v17 = vld [vmem:[#allocation7 + $0xd0] sm:$0xff]  }
  0xa7   :  { %937 = vmatpush1.bf16.msra.mxu0 %v1906_v18  ;;  %1019 = vmatpush1.bf16.msra.mxu1 %v1909_v19  ;;  %v1994_v18 = vld [vmem:[#allocation7 + $0x10] sm:$0xff]  }
  0xa8   :  { %938 = vmatprep.subr.bf16.mxu0 %v1914_v20  ;;  %1020 = vmatprep.subr.bf16.mxu1 %v1917_v21  ;;  %v1995_v19 = vld [vmem:[#allocation7 + $0x90] sm:$0xff]   ;;  %v1996_v20 = vld [vmem:[#allocation7 + $0x58] sm:$0xff]  }
  0xa9   :  { %v1997_v21 = vld [vmem:[#allocation7 + $0xd8] sm:$0xff]  }
  0xab   :  { %939 = vmatpush1.bf16.msra.mxu0 %v1912_v22  ;;  %1021 = vmatpush1.bf16.msra.mxu1 %v1915_v23  ;;  %v1998_v22 = vld [vmem:[#allocation7 + $0x18] sm:$0xff]  }
  0xac   :  { %940 = vmatprep.subr.bf16.mxu0 %v1920_v24  ;;  %1022 = vmatprep.subr.bf16.mxu1 %v1923_v25  ;;  %v1999_v23 = vld [vmem:[#allocation7 + $0x98] sm:$0xff]   ;;  %v2000_v24 = vld [vmem:[#allocation7 + $0x60] sm:$0xff]  }
  0xad   :  { %v2001_v25 = vld [vmem:[#allocation7 + $0xe0] sm:$0xff]  }
  0xaf   :  { %941 = vmatpush1.bf16.msra.mxu0 %v1918_v26  ;;  %1023 = vmatpush1.bf16.msra.mxu1 %v1921_v27  ;;  %v2002_v26 = vld [vmem:[#allocation7 + $0x20] sm:$0xff]  }
  0xb0   :  { %942 = vmatprep.subr.bf16.mxu0 %v1926_v28  ;;  %1024 = vmatprep.subr.bf16.mxu1 %v1929_v29  ;;  %v2003_v27 = vld [vmem:[#allocation7 + $0xa0] sm:$0xff]   ;;  %v2004_v28 = vld [vmem:[#allocation7 + $0x68] sm:$0xff]  }
  0xb1   :  { %v2005_v29 = vld [vmem:[#allocation7 + $0xe8] sm:$0xff]  }
  0xb3   :  { %943 = vmatpush1.bf16.msra.mxu0 %v1924_v30  ;;  %1025 = vmatpush1.bf16.msra.mxu1 %v1927_v32  ;;  %v2006_v30 = vld [vmem:[#allocation7 + $0x28] sm:$0xff]   ;;  %v2008_v32 = vld [vmem:[#allocation7 + $0x70] sm:$0xff]  }
  0xb4   :  { %944 = vmatprep.subr.bf16.mxu0 %v1932_v34  ;;  %1026 = vmatprep.subr.bf16.mxu1 %v1935_v35  ;;  %v2010_v34 = vld [vmem:[#allocation7 + $0x30] sm:$0xff]  }
  0xb5   :  { %v2011_v35 = vld [vmem:[#allocation7 + $0xb0] sm:$0xff]  }
  0xb7   :  { %945 = vmatpush1.bf16.msra.mxu0 %v1930_v36  ;;  %1027 = vmatpush1.bf16.msra.mxu1 %v1933_v37  ;;  %v2012_v36 = vld [vmem:[#allocation7 + $0x78] sm:$0xff]  }
  0xb8   :  { %946 = vmatprep.subr.bf16.mxu0 %v1938_v38  ;;  %1028 = vmatprep.subr.bf16.mxu1 %v1941_v39  ;;  %v2013_v37 = vld [vmem:[#allocation7 + $0xf8] sm:$0xff]  }
  0xb9   :  { %v2014_v38 = vld [vmem:[#allocation7 + $0x38] sm:$0xff]  }
  0xba   :  { %v2015_v39 = vld [vmem:[#allocation7 + $0xb8] sm:$0xff]  }
  0xbb   :  { %947 = vmatpush1.bf16.msra.mxu0 %v1936_v40  ;;  %1029 = vmatpush1.bf16.msra.mxu1 %v1939_v41  ;;  %v2149_v40 = vmov 0.0   ;;  %v229_v41 = vlaneseq }
  0xbc   :  { %948 = vmatprep.subr.bf16.mxu0 %v1944_v42  ;;  %1030 = vmatprep.subr.bf16.mxu1 %v1947_v43 }
  0xbd   :  { %v230_v42 = vshrl.u32 %v229_v41, 7 }
  0xbf   :  { %949 = vmatpush1.bf16.msra.mxu0 %v1942_v44  ;;  %1031 = vmatpush1.bf16.msra.mxu1 %v1945_v45  ;;  %v231_v43 = vsub.s32 0, %v230_v42  ;;  %v239_v44 = vsub.s32 2, %v230_v42  ;;  %v227_v45 = vld [vmem:[#allocation6] sm:$0xf] }
  0xc0   :  { %950 = vmatprep.subr.bf16.mxu0 %v1950_v46  ;;  %1032 = vmatprep.subr.bf16.mxu1 %v1953_v47  ;;  %v235_v46 = vsub.s32 1, %v230_v42  ;;  %v243_v47 = vsub.s32 3, %v230_v42 }
  0xc3   :  { %951 = vmatpush1.bf16.msra.mxu0 %v1948_v48  ;;  %1033 = vmatpush1.bf16.msra.mxu1 %v1951_v49  ;;  %v232_v48 = vrot.slane %v227_v45, %v231_v43  ;;  %v240_v49 = vrot.slane %v227_v45, %v239_v44 }
  0xc4   :  { %952 = vmatprep.subr.bf16.mxu0 %v1956_v50  ;;  %1034 = vmatprep.subr.bf16.mxu1 %v1959_v51  ;;  %v236_v50 = vrot.slane %v227_v45, %v235_v46  ;;  %v244_v51 = vrot.slane %v227_v45, %v243_v47 }
  0xc7   :  { %953 = vmatpush1.bf16.msra.mxu0 %v1954_v52  ;;  %1035 = vmatpush1.bf16.msra.mxu1 %v1957_v53 }
  0xc8   :  { %954 = vmatprep.subr.bf16.mxu0 %v1962_v54  ;;  %1036 = vmatprep.subr.bf16.mxu1 %v1965_v55 }
  0xcb   :  { %955 = vmatpush1.bf16.msra.mxu0 %v1960_v56  ;;  %1037 = vmatpush1.bf16.msra.mxu1 %v1963_v57 }
  0xcc   :  { %956 = vmatprep.subr.bf16.mxu0 %v1968_v58  ;;  %1038 = vmatprep.subr.bf16.mxu1 %v1971_v59 }
  0xcf   :  { %957 = vmatpush1.bf16.msra.mxu0 %v1966_v60  ;;  %1039 = vmatpush1.bf16.msra.mxu1 %v1969_v61 }
  0xd0   :  { %958 = vmatprep.subr.bf16.mxu0 %v1974_v62  ;;  %1040 = vmatprep.subr.bf16.mxu1 %v1977_v63 }
  0xd3   :  { %959 = vmatpush1.bf16.msra.mxu0 %v1972_v0  ;;  %1041 = vmatpush1.bf16.msra.mxu1 %v1975_v1 }
  0xd4   :  { %960 = vmatprep.subr.bf16.mxu0 %v1980_v2  ;;  %1042 = vmatprep.subr.bf16.mxu1 %v1983_v3 }
  0xd7   :  { %961 = vmatpush1.bf16.msra.mxu0 %v1978_v4  ;;  %1043 = vmatpush1.bf16.msra.mxu1 %v1981_v5 }
  0xd8   :  { %1696 = vmatprep.subr.bf16.mxu0 %v1984_v7  ;;  %1718 = vmatprep.subr.bf16.mxu1 %v1985_v8 }
  0xda   :  { %963 = vmatmul.mubr.bf16.vlgmr.msra.gmra.mrb[0].mxu0 %v97_v9  ;;  %1045 = vmatmul.mubr.bf16.vlgmr.msra.gmra.mrb[0].mxu1 %v97_v9  ;;  %v2017_v9 = vld [vmem:[#allocation9 + $0x8] sm:$0xff]  }
  0xdb   :  { %1697 = vmatpush3.bf16.msra.mxu0 %v1986_v10  ;;  %1719 = vmatpush3.bf16.msra.mxu1 %v1987_v11  ;;  %v2018_v10 = vld [vmem:[#allocation9 + $0x10] sm:$0xff]   ;;  %v2019_v11 = vld [vmem:[#allocation9 + $0x18] sm:$0xff]  }
  0xdc   :  { %1698 = vmatprep.subr.bf16.mxu0 %v1988_v12  ;;  %1720 = vmatprep.subr.bf16.mxu1 %v1989_v13  ;;  %v2020_v12 = vld [vmem:[#allocation9 + $0x20] sm:$0xff]   ;;  %v2021_v13 = vld [vmem:[#allocation9 + $0x28] sm:$0xff]  }
  0xdf   :  { %1699 = vmatpush3.bf16.msra.mxu0 %v1990_v14  ;;  %1721 = vmatpush3.bf16.msra.mxu1 %v1991_v15  ;;  %v2022_v14 = vld [vmem:[#allocation9 + $0x30] sm:$0xff]   ;;  %v2023_v15 = vld [vmem:[#allocation9 + $0x38] sm:$0xff]  }
  0xe0   :  { %1700 = vmatprep.subr.bf16.mxu0 %v1992_v16  ;;  %1722 = vmatprep.subr.bf16.mxu1 %v1993_v17 }
  0xe3   :  { %1701 = vmatpush3.bf16.msra.mxu0 %v1994_v18  ;;  %1723 = vmatpush3.bf16.msra.mxu1 %v1995_v19  ;;  %v1654_v18 = vld [vmem:[%s2270_s4] ss:$0 sm:$0xff] }
  0xe4   :  { %1702 = vmatprep.subr.bf16.mxu0 %v1996_v20  ;;  %1724 = vmatprep.subr.bf16.mxu1 %v1997_v21 }
  0xe7   :  { %1703 = vmatpush3.bf16.msra.mxu0 %v1998_v22  ;;  %1725 = vmatpush3.bf16.msra.mxu1 %v1999_v23 }
  0xe8   :  { %1704 = vmatprep.subr.bf16.mxu0 %v2000_v24  ;;  %1726 = vmatprep.subr.bf16.mxu1 %v2001_v25 }
  0xeb   :  { %1705 = vmatpush3.bf16.msra.mxu0 %v2002_v26  ;;  %1727 = vmatpush3.bf16.msra.mxu1 %v2003_v27 }
  0xec   :  { %1706 = vmatprep.subr.bf16.mxu0 %v2004_v28  ;;  %1728 = vmatprep.subr.bf16.mxu1 %v2005_v29 }
  0xef   :  { %1707 = vmatpush3.bf16.msra.mxu0 %v2006_v30  ;;  %1729 = vmatpush3.bf16.msra.mxu1 %v2007_v31  ;;  %v1687_v31 = vld [vmem:[%s2272_s6] ss:$0 sm:$0xff] }
  0xf0   :  { %1708 = vmatprep.subr.bf16.mxu0 %v2008_v32  ;;  %1730 = vmatprep.subr.bf16.mxu1 %v2009_v33 }
  0xf3   :  { %1709 = vmatpush3.bf16.msra.mxu0 %v2010_v34  ;;  %1731 = vmatpush3.bf16.msra.mxu1 %v2011_v35 }
  0xf4   :  { %1710 = vmatprep.subr.bf16.mxu0 %v2012_v36  ;;  %1732 = vmatprep.subr.bf16.mxu1 %v2013_v37 }
  0xf7   :  { %1711 = vmatpush3.bf16.msra.mxu0 %v2014_v38  ;;  %1733 = vmatpush3.bf16.msra.mxu1 %v2015_v39 }
  0xf8   :  { %1749 = vmatprep.subr.bf16.mxu0 %v2149_v40 }
 0x1ad   :  { %v964_v52 = vpop.f32.mrb[0].mxu0  ;;  %v1046_v53 = vpop.f32.mrb[0].mxu1 }
 0x1ae   :  { %v1769_v54 = vadd.f32 %v964_v52, %v232_v48  ;;  %v1771_v55 = vadd.f32 %v1046_v53, %v240_v49  ;;  %v966_v56 = vpop.f32.mrb[1].mxu0  ;;  %v1048_v57 = vpop.f32.mrb[1].mxu1 }
 0x1af   :  { %v1770_v58 = vadd.f32 %v966_v56, %v236_v50  ;;  %v1772_v59 = vadd.f32 %v1048_v57, %v244_v51  ;;  %v968_v60 = vpop.f32.mrb[2].mxu0  ;;  %v1050_v61 = vpop.f32.mrb[2].mxu1 }
 0x1b0   :  { %v1053_v62 = vmax.f32 %v1769_v54, 0.0  ;;  %v1055_v63 = vmax.f32 %v1771_v55, 0.0  ;;  %v969_v0 = vpop.f32.mrb[3].mxu0  ;;  %v1051_v1 = vpop.f32.mrb[3].mxu1 }
 0x1b1   :  { %v1054_v2 = vmax.f32 %v1770_v58, 0.0  ;;  %v1056_v3 = vmax.f32 %v1772_v59, 0.0 }
 0x1b2   :  { %v1057_v7 = vpack.c.bf16 %v1053_v62, %v1053_v62  ;;  %v1059_v8 = vpack.c.bf16 %v1055_v63, %v1055_v63 }
 0x1b3   :  { %v1058_v4 = vpack.c.bf16 %v1054_v2, %v1054_v2  ;;  %v1060_v5 = vpack.c.bf16 %v1056_v3, %v1056_v3 }
 0x1b5   :  { %1356 = vmatprep.mubr.bf16.mxu0 %v1058_v4  ;;  %1396 = vmatprep.mubr.bf16.mxu1 %v1060_v5 }
 0x1b6   :  { %1357 = vmatmul.mubr.bf16.vlgmr.msra.gmra.mrb[4].mxu0 %v1057_v7  ;;  %1397 = vmatmul.mubr.bf16.vlgmr.msra.gmra.mrb[4].mxu1 %v1059_v8 }
 0x1b7   :  { %1750 = vmatpush3.bf16.msra.mxu0 %v2016_v6  ;;  %1765 = vmatprep.mubr.msk.bf16.mxu0 %vm2150_vm0, %v2149_v40 }
 0x1b8   :  { %1751 = vmatprep.subr.bf16.mxu0 %v2149_v40 }
 0x1bb   :  { %1752 = vmatpush3.bf16.msra.mxu0 %v2017_v9 }
 0x1bc   :  { %1753 = vmatprep.subr.bf16.mxu0 %v2149_v40 }
 0x1bf   :  { %1754 = vmatpush3.bf16.msra.mxu0 %v2018_v10 }
 0x1c0   :  { %1755 = vmatprep.subr.bf16.mxu0 %v2149_v40 }
 0x1c3   :  { %1756 = vmatpush3.bf16.msra.mxu0 %v2019_v11 }
 0x1c4   :  { %1757 = vmatprep.subr.bf16.mxu0 %v2149_v40 }
 0x1c7   :  { %1758 = vmatpush3.bf16.msra.mxu0 %v2020_v12 }
 0x1c8   :  { %1759 = vmatprep.subr.bf16.mxu0 %v2149_v40 }
 0x1cb   :  { %1760 = vmatpush3.bf16.msra.mxu0 %v2021_v13 }
 0x1cc   :  { %1761 = vmatprep.subr.bf16.mxu0 %v2149_v40 }
 0x1cf   :  { %1762 = vmatpush3.bf16.msra.mxu0 %v2022_v14 }
 0x1d0   :  { %1763 = vmatprep.subr.bf16.mxu0 %v2149_v40 }
 0x1d3   :  { %1764 = vmatpush3.bf16.msra.mxu0 %v2023_v15 }
 0x289   :  { %v1712_v16 = vpop.f32.mrb[4].mxu0  ;;  %v1734_v17 = vpop.f32.mrb[4].mxu1 }
 0x28a   :  { %v1713_v19 = vpop.f32.mrb[5].mxu0  ;;  %v1735_v20 = vpop.f32.mrb[5].mxu1 }
 0x28b   :  { %v1714_v21 = vadd.f32 %v1713_v19, %v1712_v16  ;;  %v1736_v22 = vadd.f32 %v1735_v20, %v1734_v17  ;;  %v1715_v23 = vpop.f32.mrb[6].mxu0  ;;  %v1737_v24 = vpop.f32.mrb[6].mxu1 }
 0x28c   :  { %v1716_v25 = vpop.f32.mrb[7].mxu0  ;;  %v1738_v26 = vpop.f32.mrb[7].mxu1 }
 0x28d   :  { %v1359_v27 = vadd.f32 %v1714_v21, %v1654_v18 }
 0x28f   :  { %v1399_v28 = vadd.f32 %v1736_v22, %v1359_v27 }
 0x291   :  { %v1404_v29 = vmax.f32 %v1399_v28, 0.0 }
 0x293   :  { %v1405_v30 = vpack.c.bf16 %v1404_v29, %v1404_v29 }
 0x295   :  { %1766 = vmatmul.mubr.bf16.vlgmr.msra.gmra.mrb[8].mxu0 %v1405_v30 }
 0x368   :  { %v1511_v32 = vpop.f32.mrb[8].mxu0 }
 0x369   :  { %v1512_v33 = vadd.f32 %v1687_v31, %v1511_v32  ;;  %v1767_v34 = vpop.f32.mrb[9].mxu0 }
 0x36a   :  { %v1514_v35 = vpop.f32.mrb[10].mxu0 }
 0x36b   :  { %v1517_v36 = vpack.c.bf16 %v1512_v33, %v1512_v33  ;;  %v1768_v37 = vpop.f32.mrb[11].mxu0 }
 0x36d   :  { %1518 = vst [vmem:[%s2273_s7] sm:$0xf] %v1517_v36 }
 0x36e   :  { %1523 = vsyncpa [#allocation3], 1 }
 0x36f   :  { %1524 = vsyncpa [#allocation5], 1 }
 0x370   :  { %1525 = vsyncpa [#allocation8], 1 }

</bundles_post_ra>
